<compile_context>
chip_gen: v7x
topology: tpu7x:2x2x1
jax: 0.10.0
libtpu: 0.0.40
codegen_flags: <defaults>
</compile_context>

<pallas_src>
from functools import partial

import jax
import jax.numpy as jnp
import numpy as np
from jax.experimental import pallas as pl
from jax.experimental.pallas import tpu as pltpu


# ---------------------------------------------------------------------------
# Tiling helpers
# ---------------------------------------------------------------------------
def _sublane_multiple(*dtypes):
    """Sublane alignment for block second-to-last dims: 8 for 32-bit, 16 for
    sub-32-bit (bf16 packs 16 rows per vreg)."""
    mult = 8
    for dt in dtypes:
        if dt is not None and jnp.dtype(dt).itemsize < 4:
            mult = 16
    return mult


def _pick_tile(total, target, mult=8):
    """Largest divisor of `total` that is <= target and a multiple of `mult`.
    Falls back to the full extent if no such divisor exists."""
    if total <= target:
        return total
    start = (target // mult) * mult
    for t in range(start, mult - 1, -mult):
        if total % t == 0:
            return t
    # TODO(synk): pad the sequence + mask instead of this full-extent fallback
    # for awkward sequence lengths (full extent can blow VMEM on v7x).
    return total


# ---------------------------------------------------------------------------
# Kernel 1: tiled linear projection  y = x @ W + b   (W already in x@W layout)
# ---------------------------------------------------------------------------
def _linear_kernel(x_ref, w_ref, b_ref, y_ref):
    x = x_ref[0]                                      # (tm, Din)
    if x.dtype != w_ref.dtype:
        x = x.astype(w_ref.dtype)
    y = jnp.dot(x, w_ref[...], preferred_element_type=jnp.float32) + b_ref[...]
    y_ref[0] = y.astype(y_ref.dtype)


def _linear_proj(x, w, b, *, out_dtype, block, vmem_limit_bytes=None):
    B, L, Din = x.shape
    Dout = w.shape[1]
    tm = _pick_tile(L, block, _sublane_multiple(x.dtype, out_dtype))

    cp = dict(dimension_semantics=("parallel", "parallel"))
    if vmem_limit_bytes is not None:
        cp["vmem_limit_bytes"] = vmem_limit_bytes

    # TODO(synk): the constant-index weight/bias blocks are double-buffered by
    # default; single-buffer them (pipeline_mode=pl.Buffered(1)) or feed bf16
    # weights to halve/quarter that reservation at D=1024.
    return pl.pallas_call(
        _linear_kernel,
        out_shape=jax.ShapeDtypeStruct((B, L, Dout), out_dtype),
        grid_spec=pltpu.PrefetchScalarGridSpec(
            num_scalar_prefetch=0,
            grid=(B, L // tm),
            in_specs=[
                pl.BlockSpec((1, tm, Din), lambda bb, i: (bb, i, 0)),
                pl.BlockSpec((Din, Dout), lambda bb, i: (0, 0)),
                pl.BlockSpec((1, Dout), lambda bb, i: (0, 0)),
            ],
            out_specs=pl.BlockSpec((1, tm, Dout), lambda bb, i: (bb, i, 0)),
        ),
        compiler_params=pltpu.CompilerParams(**cp),
    )(x, w, b)


# ---------------------------------------------------------------------------
# Kernel 2: flash attention over pre-projected Q and fused K|V
# ---------------------------------------------------------------------------
def _flash_attn_kernel(q_ref, kv_ref, o_ref, m_sc, l_sc, acc_sc, *,
                       num_heads, compute_dtype):
    # q_ref:  (1, tq, D)   scale already folded into the Q projection
    # kv_ref: (1, tkv, 2D) = [K | V] projected activations
    # scratch: m_sc/l_sc (H, tq, 1) fp32, acc_sc (tq, D) fp32
    tq, d_model = acc_sc.shape
    head_dim = d_model // num_heads
    ki = pl.program_id(2)

    @pl.when(ki == 0)
    def _init():
        m_sc[...] = jnp.full(m_sc.shape, -jnp.inf, dtype=m_sc.dtype)
        l_sc[...] = jnp.zeros(l_sc.shape, dtype=l_sc.dtype)
        acc_sc[...] = jnp.zeros(acc_sc.shape, dtype=acc_sc.dtype)

    q = q_ref[0]        # (tq, D)  already in compute dtype
    kv = kv_ref[0]      # (tkv, 2D)

    alphas = []
    pvs = []
    for h in range(num_heads):
        lo = h * head_dim
        hi = lo + head_dim
        qh = q[:, lo:hi]                           # (tq, Dh)
        kh = kv[:, lo:hi]                          # (tkv, Dh)
        vh = kv[:, d_model + lo:d_model + hi]      # (tkv, Dh)

        # Contract the head dim of both operands directly (no kh.T relayout).
        s = jax.lax.dot_general(qh, kh, (((1,), (1,)), ((), ())),
                                preferred_element_type=jnp.float32)  # (tq, tkv)

        m_prev = m_sc[h]                                        # (tq, 1)
        m_new = jnp.maximum(m_prev, jnp.max(s, axis=-1, keepdims=True))
        alpha = jnp.exp(m_prev - m_new)
        p = jnp.exp(s - m_new)                                   # fp32 softmax
        l_sc[h] = alpha * l_sc[h] + jnp.sum(p, axis=-1, keepdims=True)
        m_sc[h] = m_new

        # Match the reference: probabilities cast to the compute dtype before
        # the p@V matmul (no-op on the fp32 path).
        p_mm = p if compute_dtype is None else p.astype(compute_dtype)
        pv = jnp.dot(p_mm, vh, preferred_element_type=jnp.float32)  # (tq, Dh)

        alphas.append(jnp.broadcast_to(alpha, (tq, head_dim)))
        pvs.append(pv)

    # Single lane-dense (tq, D) accumulator update per KV step.
    alpha_full = jnp.concatenate(alphas, axis=-1)   # (tq, D)
    pv_full = jnp.concatenate(pvs, axis=-1)         # (tq, D)
    acc_sc[...] = alpha_full * acc_sc[...] + pv_full

    @pl.when(ki == pl.num_programs(2) - 1)
    def _finalize():
        l_full = jnp.concatenate(
            [jnp.broadcast_to(l_sc[h], (tq, head_dim)) for h in range(num_heads)],
            axis=-1)
        inv_l = pl.reciprocal(l_full, approx=compute_dtype is not None)
        o_ref[0] = (acc_sc[...] * inv_l).astype(o_ref.dtype)


# ---------------------------------------------------------------------------
# Weight prep (cache the result across calls)
# ---------------------------------------------------------------------------
def prepare_attention_params(wq, bq, wk, bk, wv, bv, *, num_heads,
                             compute_dtype=None):
    """Transpose to x @ W layout, fold 1/sqrt(head_dim) into the Q projection,
    fuse K|V into a single (D, 2D) projection, optionally cast weights to the
    MXU compute dtype (biases stay fp32 for fp32 accumulation)."""
    d_model = wq.shape[1]
    head_dim = d_model // num_heads
    scale = float(head_dim) ** -0.5
    wq_t = wq.T * scale                                           # (D, D)
    bq_s = (bq * scale).reshape(1, d_model).astype(jnp.float32)   # (1, D)
    wkv_t = jnp.concatenate([wk.T, wv.T], axis=1)                 # (D, 2D)
    bkv = jnp.concatenate([bk, bv]).reshape(1, 2 * d_model).astype(jnp.float32)
    wdt = jnp.float32 if compute_dtype is None else compute_dtype
    return wq_t.astype(wdt), bq_s, wkv_t.astype(wdt), bkv


# ---------------------------------------------------------------------------
# Host wrapper: projection passes + flash attention
# ---------------------------------------------------------------------------
def vjepa2_attention(x_q, x_kv, wq_t, bq_s, wkv_t, bkv, *, num_heads,
                     q_block=256, kv_block=512, proj_block=256,
                     compute_dtype=None, vmem_limit_bytes=None):
    """x_q: (B, Lq, D) query-side hidden states; x_kv: (B, Lkv, D) hidden
    states the keys/values are projected from (== x_q for self-attention).
    Weights must come from prepare_attention_params.  Returns (B, Lq, D) in
    x_q.dtype — eager_attention_forward (eval mode, no mask / RoPE) reshaped
    back to (B, Lq, D)."""
    B, Lq, d_model = x_q.shape
    Lkv = x_kv.shape[1]
    act_dtype = jnp.float32 if compute_dtype is None else compute_dtype

    # Projections are computed exactly once per token (no re-projection inside
    # the attention kernel).  Scale is already folded into wq_t / bq_s.
    q = _linear_proj(x_q, wq_t, bq_s, out_dtype=act_dtype, block=proj_block,
                     vmem_limit_bytes=vmem_limit_bytes)          # (B, Lq, D)
    kv = _linear_proj(x_kv, wkv_t, bkv, out_dtype=act_dtype, block=proj_block,
                      vmem_limit_bytes=vmem_limit_bytes)         # (B, Lkv, 2D)

    mult = _sublane_multiple(act_dtype)
    tq = _pick_tile(Lq, q_block, mult)
    tkv = _pick_tile(Lkv, kv_block, mult)

    kernel = partial(_flash_attn_kernel, num_heads=num_heads,
                     compute_dtype=compute_dtype)

    grid_spec = pltpu.PrefetchScalarGridSpec(
        num_scalar_prefetch=0,
        grid=(B, Lq // tq, Lkv // tkv),
        in_specs=[
            pl.BlockSpec((1, tq, d_model), lambda b, qi, ki: (b, qi, 0)),
            # KV grid axis indexes the KV-sequence block dimension (bugfix).
            # TODO(synk): try pipeline_mode=pl.Buffered(3) here to hide DMA
            # jitter on v5e once per-step compute shrinks further.
            pl.BlockSpec((1, tkv, 2 * d_model), lambda b, qi, ki: (b, ki, 0)),
        ],
        out_specs=pl.BlockSpec((1, tq, d_model), lambda b, qi, ki: (b, qi, 0)),
        scratch_shapes=[
            pltpu.VMEM((num_heads, tq, 1), jnp.float32),   # running max  m
            pltpu.VMEM((num_heads, tq, 1), jnp.float32),   # running sum  l
            pltpu.VMEM((tq, d_model), jnp.float32),        # output accumulator
        ],
    )

    cp = dict(dimension_semantics=("parallel", "parallel", "arbitrary"))
    if vmem_limit_bytes is not None:
        cp["vmem_limit_bytes"] = vmem_limit_bytes

    return pl.pallas_call(
        kernel,
        out_shape=jax.ShapeDtypeStruct((B, Lq, d_model), x_q.dtype),
        grid_spec=grid_spec,
        compiler_params=pltpu.CompilerParams(**cp),
    )(q, kv)


# ---------------------------------------------------------------------------
# Pure-JAX reference (mirror of the PyTorch eager_attention_forward path)
# ---------------------------------------------------------------------------
def _reference_forward(x_q, x_kv, wq, bq, wk, bk, wv, bv, num_heads):
    B, Lq, D = x_q.shape
    Lkv = x_kv.shape[1]
    Dh = D // num_heads
    scale = float(Dh) ** -0.5
    qp = x_q @ wq.T + bq
    kp = x_kv @ wk.T + bk
    vp = x_kv @ wv.T + bv
    qh = qp.reshape(B, Lq, num_heads, Dh).transpose(0, 2, 1, 3)
    kh = kp.reshape(B, Lkv, num_heads, Dh).transpose(0, 2, 1, 3)
    vh = vp.reshape(B, Lkv, num_heads, Dh).transpose(0, 2, 1, 3)
    s = jnp.einsum('bhqd,bhkd->bhqk', qh, kh) * scale
    p = jax.nn.softmax(s.astype(jnp.float32), axis=-1).astype(x_q.dtype)
    o = jnp.einsum('bhqk,bhkd->bhqd', p, vh)
    return o.transpose(0, 2, 1, 3).reshape(B, Lq, D)


if __name__ == "__main__":
    # Small config consistent with the module: hidden_size=32, heads=4,
    # head_dim=8, 32 patch tokens, self-attention (eval mode).  Tile sizes are
    # chosen so the demo exercises multi-tile Lq AND a multi-step online-softmax
    # KV axis (Lkv > tkv), which also validates the fixed KV index_map.
    B, L, D, H = 2, 32, 32, 4

    key = jax.random.PRNGKey(0)
    ks = jax.random.split(key, 7)
    hidden_states = jax.random.normal(ks[0], (B, L, D), dtype=jnp.float32)

    init = 0.05
    wq = init * jax.random.normal(ks[1], (D, D), dtype=jnp.float32)
    wk = init * jax.random.normal(ks[2], (D, D), dtype=jnp.float32)
    wv = init * jax.random.normal(ks[3], (D, D), dtype=jnp.float32)
    bq = init * jax.random.normal(ks[4], (D,), dtype=jnp.float32)
    bk = init * jax.random.normal(ks[5], (D,), dtype=jnp.float32)
    bv = init * jax.random.normal(ks[6], (D,), dtype=jnp.float32)

    ref = _reference_forward(hidden_states, hidden_states,
                             wq, bq, wk, bk, wv, bv, H)

    # fp32 path — matches the reference (eval-mode eager attention) tightly.
    params32 = prepare_attention_params(wq, bq, wk, bk, wv, bv, num_heads=H)
    out32 = vjepa2_attention(hidden_states, hidden_states, *params32,
                             num_heads=H, q_block=8, kv_block=16)
    out32 = jax.block_until_ready(out32)
    np.testing.assert_allclose(np.asarray(out32), np.asarray(ref),
                               rtol=1e-4, atol=1e-5)

    # bf16 MXU path — bf16 matmuls with fp32 accumulation + fp32 softmax and
    # the EUP approximate reciprocal; checked at bf16 tolerance.
    params16 = prepare_attention_params(wq, bq, wk, bk, wv, bv, num_heads=H,
                                        compute_dtype=jnp.bfloat16)
    out16 = vjepa2_attention(hidden_states, hidden_states, *params16,
                             num_heads=H, q_block=16, kv_block=16,
                             compute_dtype=jnp.bfloat16)
    out16 = jax.block_until_ready(out16)
    np.testing.assert_allclose(np.asarray(out16, dtype=np.float32),
                               np.asarray(ref), rtol=5e-2, atol=5e-2)

    print("KERNEL_OK")
</pallas_src>

<mosaic_0001>
module attributes {stable_mosaic.version = 11 : i64} {
  func.func @_linear_kernel(%arg0: i32, %arg1: i32, %arg2: memref<1x32x32xf32, #tpu.memory_space<vmem>>, %arg3: memref<32x32xf32, #tpu.memory_space<vmem>>, %arg4: memref<1x32xf32, #tpu.memory_space<vmem>>, %arg5: memref<1x32x32xf32, #tpu.memory_space<vmem>>) attributes {dimension_semantics = [#tpu.dimension_semantics<parallel>, #tpu.dimension_semantics<parallel>], iteration_bounds = array<i64: 2, 1>, scalar_prefetch = 0 : i64, scratch_operands = 0 : i64, tpu.core_type = #tpu.core_type<tc>, window_params = [{transform_indices = @transform_0, window_bounds = array<i64: 1, 32, 32>}, {pipeline_mode = #tpu.pipeline_mode<synchronous>, transform_indices = @transform_1, window_bounds = array<i64: 32, 32>}, {pipeline_mode = #tpu.pipeline_mode<synchronous>, transform_indices = @transform_2, window_bounds = array<i64: 1, 32>}, {transform_indices = @transform_3, window_bounds = array<i64: 1, 32, 32>}]} {
    %c0 = arith.constant 0 : index
    %c0_0 = arith.constant 0 : index
    %c0_1 = arith.constant 0 : index
    %0 = vector.load %arg2[%c0, %c0_0, %c0_1] : memref<1x32x32xf32, #tpu.memory_space<vmem>>, vector<1x32x32xf32>
    %1 = vector.shape_cast %0 : vector<1x32x32xf32> to vector<32x32xf32>
    %c0_2 = arith.constant 0 : index
    %c0_3 = arith.constant 0 : index
    %2 = vector.load %arg3[%c0_2, %c0_3] : memref<32x32xf32, #tpu.memory_space<vmem>>, vector<32x32xf32>
    %cst = arith.constant dense<0.000000e+00> : vector<32x32xf32>
    %3 = tpu.matmul %1, %2, %cst {dimension_numbers = #tpu.dot_dimension_numbers<[1], [0], [0], [1], [0, 0, 1, 1], [], []>} : vector<32x32xf32>, vector<32x32xf32>, vector<32x32xf32> -> vector<32x32xf32>
    %c0_4 = arith.constant 0 : index
    %c0_5 = arith.constant 0 : index
    %4 = vector.load %arg4[%c0_4, %c0_5] : memref<1x32xf32, #tpu.memory_space<vmem>>, vector<1x32xf32>
    %5 = vector.broadcast %4 : vector<1x32xf32> to vector<32x32xf32>
    %6 = arith.addf %3, %5 : vector<32x32xf32>
    %c0_6 = arith.constant 0 : index
    %c0_7 = arith.constant 0 : index
    %c0_8 = arith.constant 0 : index
    %7 = vector.load %arg5[%c0_6, %c0_7, %c0_8] : memref<1x32x32xf32, #tpu.memory_space<vmem>>, vector<1x32x32xf32>
    %8 = vector.shape_cast %7 : vector<1x32x32xf32> to vector<32x32xf32>
    %9 = vector.shape_cast %6 : vector<32x32xf32> to vector<1x32x32xf32>
    tpu.vector_store %arg5[%c0_6, %c0_7, %c0_8], %9 {strides = array<i32>} : memref<1x32x32xf32, #tpu.memory_space<vmem>>, vector<1x32x32xf32>,
    return
  }
  func.func @transform_0(%arg0: i32, %arg1: i32) -> (i32, i32, i32) {
    %c0_i32 = arith.constant 0 : i32
    %c0_i32_0 = arith.constant 0 : i32
    return %arg0, %arg1, %c0_i32 : i32, i32, i32
  }
  func.func @transform_1(%arg0: i32, %arg1: i32) -> (i32, i32) {
    %c0_i32 = arith.constant 0 : i32
    %c0_i32_0 = arith.constant 0 : i32
    %c0_i32_1 = arith.constant 0 : i32
    return %c0_i32, %c0_i32_0 : i32, i32
  }
  func.func @transform_2(%arg0: i32, %arg1: i32) -> (i32, i32) {
    %c0_i32 = arith.constant 0 : i32
    %c0_i32_0 = arith.constant 0 : i32
    %c0_i32_1 = arith.constant 0 : i32
    return %c0_i32, %c0_i32_0 : i32, i32
  }
  func.func @transform_3(%arg0: i32, %arg1: i32) -> (i32, i32, i32) {
    %c0_i32 = arith.constant 0 : i32
    %c0_i32_0 = arith.constant 0 : i32
    return %arg0, %arg1, %c0_i32 : i32, i32, i32
  }
}

</mosaic_0001>

<bundles_post_ra>
// kernel: tpu_custom_call.1
= control target key start
LH: loop header
LB: loop body
LE: loop exit
PB: predicated region body
PF: predicated region fallthrough
CT: control target
= control target key end

     0   :  { %8 = vsyncpa [#allocation3], 0  ;;  %s998_s0 = inlined_call_operand.hbm [shape: f32[2,32,32], index: 0, kind: input, shape index: {}]   ;;  %s999_s1 = inlined_call_operand.hbm [shape: f32[32,32], index: 1, kind: input, shape index: {}]   ;;  %s1000_s2 = inlined_call_operand.vmem [shape: f32[1,32], index: 2, kind: input, shape index: {}]   ;;  %s1001_s3 = inlined_call_operand.hbm [shape: f32[2,32,32], index: 3, kind: output, shape index: {}]  }
   0x1   :  { %10 = vsyncpa [#allocation3 + $0x1], 0 }
   0x2   :  { %11 = vsyncpa [#allocation6], 0 }
   0x3   :  { %12 = vsyncpa [#allocation4], 0 }
   0x4   :  { %14 = vsyncpa [#allocation4 + $0x1], 0  ;;  %s762_s12 = smov 0   ;;  %s764_s13 = smov 0  }
   0x5   :  { %s766_s14 = smov 0   ;;  %s768_s15 = smov 0  }
   0x6   :  { %s770_s16 = smov 0   ;;  %s772_s17 = smov 0  }
   0x7 LB: > { %s454_s18 = sadd.s32 4294967295, %s733_s17   ;;  %s455_s19 = sadd.s32 4294967294, %s733_s17   ;;  %s733_s17 = sphi %s772_s17, %s20_s17   ;;  %s729_s16 = sphi %s770_s16, %s1025_s16   ;;  %s725_s15 = sphi %s768_s15, %s1024_s15   ;;  %s721_s14 = sphi %s766_s14, %s1023_s14   ;;  %s717_s13 = sphi %s764_s13, %s1022_s13   ;;  %s713_s12 = sphi %s762_s12, %s1021_s12  }
   0x8   : > { %p54_p0 = scmp.ne.s32.totalorder %s717_s13, %s713_s12  ;;  %p796_p1 = scmp.eq.s32.totalorder %s454_s18, 0 }
   0x9   : > { %p800_p2 = scmp.eq.s32.totalorder %s454_s18, 1  ;;  %p128_p3 = scmp.eq.s32.totalorder %s455_s19, 1 }
   0xa   : > { %s1006_s20 = scalar_select %p796_p1, 1, 0 }
   0xb   : > { %s1007_s21 = scalar_select %p800_p2, 1, 0 }
   0xc   : > { %p806_p4 = por %p796_p1, %p54_p0  ;;  %p456_p5 = scmp.ge.s32.totalorder %s733_s17, 1 }
   0xd   : > { %p811_p6 = por %p128_p3, %p54_p0  ;;  %p135_p7 = scmp.lt.s32.totalorder %s733_s17, 3 }
   0xe   : > { %s1008_s22 = scalar_select %p806_p4, 1, 0 }
   0xf   : > { %s1009_s23 = scalar_select %p811_p6, 1, 0 }
  0x10   : > { %p816_p8 = pnand %p456_p5, %p135_p7  ;;  %s735_s25 = smov [#allocation5]  }
  0x11   : > { %s147_s26 = sshll.u32 %s735_s25, 4  ;;  %s32_s28 = sadd.s32 1, %s729_s16  ;;  %s148_s26 = int_to_ptr.vmem [resolvable:$true] %s147_s26 }
  0x12   : > { %s1010_s24 = scalar_select %p816_p8, 1, 0 }
  0x13   : > { %p520_p9 = pneg %p816_p8  ;;  %s589_s4 = scalar_lea.hbm %s999_s1, 512 }
  0x14   : > { %p590_p12 = scmp.ne.s32.totalorder %s999_s1, %s589_s4  ;;  %p596_p5 = scmp.lt.u32.totalorder %s589_s4, %s999_s1 }
  0x15   : > { %p825_p11 = pnand %p520_p9, %p796_p1 }
  0x17   : > { %p591_p13 = pneg %p825_p11 }
  0x19   : > { %p592_p0 = pnand %p591_p13, %p590_p12 }
  0x1b   : > { %p593_p3 = pneg %p592_p0 }
  0x1d   : > { %p598_p7 = pnand %p596_p5, %p593_p3 }
  0x1f   : > { %601 = shalt.err (!%p598_p7)
}
  0x20   : > { %s602_s9 = scalar_lea.vmem %s148_s26, 512  ;;  %p610_p1 = scmp.lt.s32.totalorder %s148_s26, %s148_s26 }
  0x21   : > { %p603_p9 = scmp.ne.s32.totalorder %s148_s26, %s602_s9  ;;  %p611_p4 = scmp.lt.s32.totalorder %s602_s9, %s602_s9 }
  0x23   : > { %p605_p10 = pnand %p603_p9, %p591_p13  ;;  %p612_p8 = por %p611_p4, %p610_p1 }
  0x25   : > { %p606_p6 = pneg %p605_p10 }
  0x27   : > { %p613_p2 = pnand %p612_p8, %p606_p6 }
  0x29   : > { %616 = shalt.err (!%p613_p2)
}
  0x2a   : > { %s736_s10 = smov 128   ;;  %s737_s11 = smov 8  }
  0x2b   : > { %523 = dma.hbm_to_vmem [thread:$0]  (!%p825_p11), %s999_s1, 512, %s148_s26, [#allocation6], %s736_s10, %s736_s10, %s737_s11  }
  0x2c   : > { %p34_p1 = scmp.ge.s32.totalorder %s32_s28, 2  ;;  %s41_s25 = sadd.s32 1, %s721_s14 }
  0x2d   : > { %p48_p2 = scmp.ne.s32.totalorder %s721_s14, %s717_s13  ;;  %p49_p4 = scmp.eq.s32.totalorder %s733_s17, 0 }
  0x2e   : > { %s1027_s28 = smov (%p34_p1, %s32_s28), 0  ;;  %p1013_p8 = scmp.ne.s32.totalorder %s1007_s21, 0 }
  0x2f   : > { %p855_p6 = por %p49_p4, %p48_p2  ;;  %s36_s30 = ssub.s32 %s729_s16, %s1027_s28 }
  0x30   : > { %p861_p10 = por %p1013_p8, %p48_p2  ;;  %p533_p12 = scmp.lt.s32.totalorder %s733_s17, 2 }
  0x31   : > { %p39_p11 = scmp.eq.s32.totalorder %s36_s30, 0  ;;  %s164_s26 = sand.u32 1, %s721_s14  }
  0x32   : > { %s459_s4 = sshll.u32 %s164_s26, 5  ;;  %s476_s6 = sshll.u32 %s729_s16, 9 }
  0x33   : > { %s870_s5 = scalar_select %p39_p11, %s721_s14, %s41_s25  }
  0x34   : > { %s876_s9 = scalar_lea.hbm %s998_s0, %s476_s6  ;;  %s168_s21 = scalar_lea.vmem [#allocation2], %s459_s4 }
  0x35   : > { %s177_s18 = sshll.u32 %s168_s21, 4  ;;  %p882_p13 = pnand %p533_p12, %p855_p6  ;;  %s878_s18 = int_to_ptr.vmem [resolvable:$true] %s177_s18 }
  0x36   : > { %s886_s25 = scalar_lea.sflag [#allocation3], %s164_s26  ;;  %s617_s30 = scalar_lea.hbm %s876_s9, 512 }
  0x37   : > { %p618_p0 = scmp.ne.s32.totalorder %s876_s9, %s617_s30  ;;  %p619_p3 = pneg %p882_p13 }
  0x38   : > { %s622_s29 = scalar_lea.hbm %s998_s0, 1024  ;;  %p623_p9 = scmp.lt.u32.totalorder %s876_s9, %s998_s0 }
  0x39   : > { %p620_p5 = pnand %p619_p3, %p618_p0  ;;  %p624_p1 = scmp.lt.u32.totalorder %s622_s29, %s617_s30 }
  0x3a   : > { %p626_p4 = scmp.lt.u32.totalorder %s617_s30, %s876_s9 }
  0x3b   : > { %p621_p7 = pneg %p620_p5  ;;  %p625_p2 = por %p624_p1, %p623_p9 }
  0x3d   : > { %p627_p6 = por %p626_p4, %p625_p2 }
  0x3f   : > { %p628_p8 = pnand %p627_p6, %p621_p7 }
  0x41   : > { %631 = shalt.err (!%p628_p8)
}
  0x42   : > { %s632_s26 = scalar_lea.vmem %s878_s18, 512  ;;  %s738_s21 = smov [#allocation2]  }
  0x43   : > { %p633_p12 = scmp.ne.s32.totalorder %s878_s18, %s632_s26  ;;  %s637_s4 = sshll.u32 %s738_s21, 4  ;;  %s638_s4 = int_to_ptr.vmem [resolvable:$false] %s637_s4 }
  0x44   : > { %s639_s6 = scalar_lea.vmem %s638_s4, 1024  ;;  %p640_p5 = scmp.lt.s32.totalorder %s878_s18, %s638_s4 }
  0x45   : > { %p635_p11 = pnand %p633_p12, %p619_p3  ;;  %p641_p9 = scmp.lt.s32.totalorder %s639_s6, %s632_s26 }
  0x47   : > { %p636_p0 = pneg %p635_p11  ;;  %p642_p1 = por %p641_p9, %p640_p5 }
  0x49   : > { %p643_p2 = pnand %p642_p1, %p636_p0 }
  0x4b   : > { %646 = shalt.err (!%p643_p2)
}
  0x4c   : > { %527 = dma.hbm_to_vmem [thread:$0]  (!%p882_p13), %s876_s9, 512, %s878_s18, %s886_s25, %s736_s10, %s736_s10, %s737_s11  }
  0x4d   : > { %p1016_p3 = scmp.ne.s32.totalorder %s1010_s24, 0 }
  0x4e   : > { %s920_s30 = sand.u32 (!%p1016_p3), 1, %s717_s13   ;;  %p1017_p7 = scmp.ne.s32.totalorder (!%p1016_p3), %s1008_s22, 0 }
  0x4f   : > { %189 = sbr.rel (%p1016_p3) target bundleno = 332 (0x14c), region = 32  ;;  %s463_s29 = sshll.u32 (!%p1016_p3), %s920_s30, 5 }
  0x50   : > { %s192_s7 = scalar_lea.sflag (!%p1016_p3), [#allocation3], %s920_s30  ;;  %s195_s8 = scalar_lea.vmem (!%p1016_p3), [#allocation2], %s463_s29 }
  0x56   : > { %700 = dma.done.wait (%p1017_p7), %s192_s7, 512  }
  0x57   : > { %702 = vsyncadd (%p1017_p7), %s192_s7, 4294966784  ;;  %p1018_p4 = scmp.ne.s32.totalorder %s1006_s20, 0 }
  0x59   : > { %704 = dma.done.wait (%p1018_p4), [#allocation6], 512  }
  0x5a   : > { %706 = vsyncadd (%p1018_p4), [#allocation6], 4294966784  ;;  %vm239_vm0 = vcmask 261120   ;;  %v228_v0 = vld [vmem:[#allocation5] sm:$0xff]  ;;  %v229_v1 = vld [vmem:[#allocation5 + $0x8] sm:$0xff]  ;;  %s221_s20 = scalar_lea.vmem [#allocation7], %s463_s29 }
  0x5b   : > { %v230_v2 = vld [vmem:[#allocation5 + $0x10] sm:$0xff]  ;;  %v500_v3 = vpack.c.bf16 %v229_v1, %v228_v0  ;;  %v231_v4 = vld [vmem:[#allocation5 + $0x18] sm:$0xff]  ;;  %v224_v5 = vld [vmem:[%s195_s8] sm:$0xff]  ;;  %s357_s22 = sshll.u32 %s221_s20, 4  ;;  %s477_s11 = sshll.u32 %s725_s15, 9  ;;  %s940_s22 = int_to_ptr.vmem [resolvable:$true] %s357_s22 }
  0x5c   : > { %v226_v6 = vld [vmem:[%s195_s8 + $0x10] sm:$0xff]  ;;  %v504_v7 = vpack.c.bf16 %v231_v4, %v230_v2  ;;  %494 = vmatprep.mubr.msk.f32.mxu0 %vm239_vm0, %v224_v5  ;;  %v225_v8 = vld [vmem:[%s195_s8 + $0x8] sm:$0xff]  ;;  %v227_v9 = vld [vmem:[%s195_s8 + $0x18] sm:$0xff]  ;;  %s945_s19 = scalar_lea.hbm %s1001_s3, %s477_s11  ;;  %s342_s15 = scalar_lea.sflag [#allocation4], %s920_s30 }
  0x5d   : > { %497 = vmatprep.mubr.msk.f32.mxu1 %vm239_vm0, %v226_v6  ;;  %501 = vmatprep.subr.bf16.mxu0 %v500_v3  ;;  %v466_v10 = vld [vmem:[%s1000_s2] ss:$0 sm:$0xff]  ;;  %s647_s25 = scalar_lea.vmem %s940_s22, 512  ;;  %s739_s26 = smov [#allocation7]  }
  0x5e   : > { %508 = vmatprep.subr.bf16.mxu1 %v500_v3  ;;  %503 = vmatpush3.bf16.msra.mxu0 %v500_v3  ;;  %p648_p13 = scmp.ne.s32.totalorder %s940_s22, %s647_s25  ;;  %s651_s21 = sshll.u32 %s739_s26, 4  ;;  %s652_s21 = int_to_ptr.vmem [resolvable:$false] %s651_s21 }
  0x5f   : > { %510 = vmatpush3.bf16.msra.mxu1 %v500_v3  ;;  %505 = vmatprep.subr.bf16.mxu0 %v504_v7  ;;  %s653_s4 = scalar_lea.vmem %s652_s21, 1024  ;;  %p654_p12 = scmp.lt.s32.totalorder %s940_s22, %s652_s21 }
  0x60   : > { %509 = vmatprep.subr.bf16.mxu1 %v504_v7  ;;  %p649_p6 = pnand %p648_p13, %p861_p10  ;;  %p655_p11 = scmp.lt.s32.totalorder %s653_s4, %s647_s25 }
  0x62   : > { %507 = vmatpush3.bf16.msra.mxu0 %v504_v7  ;;  %p650_p8 = pneg %p649_p6  ;;  %p656_p0 = por %p655_p11, %p654_p12 }
  0x63   : > { %511 = vmatpush3.bf16.msra.mxu1 %v504_v7 }
  0x64   : > { %p657_p5 = pnand %p656_p0, %p650_p8 }
  0x65   : > { %495 = vmatmul.mubr.msk.f32.vlgmr.msra.gmra.mrb[0].mxu0 %vm239_vm0, %v225_v8 }
  0x66   : > { %498 = vmatmul.mubr.msk.f32.vlgmr.msra.gmra.mrb[0].mxu1 %vm239_vm0, %v227_v9 }
 0x138   : > { %v496_v11 = vpop.f32.mrb[0].mxu0 }
 0x139   : > { %v499_v12 = vpop.f32.mrb[0].mxu1  ;;  %v324_v13 = vadd.f32 %v496_v11, %v466_v10  ;;  %v318_v15 = vpop.f32.mrb[1].mxu0 }
 0x13a   : > { %v334_v14 = vadd.f32 %v499_v12, %v466_v10  ;;  %v328_v16 = vpop.f32.mrb[1].mxu1  ;;  %v319_v17 = vadd.f32 %v466_v10, %v318_v15 }
 0x13b   : > { %v329_v18 = vadd.f32 %v466_v10, %v328_v16  ;;  %338 = vst.msk [vmem:[%s221_s20 + $0x8] sm:$0xff] %vm239_vm0, %v324_v13 }
 0x13c   : > { %340 = vst.msk [vmem:[%s221_s20 + $0x18] sm:$0xff] %vm239_vm0, %v334_v14  ;;  %337 = vst.msk [vmem:[%s221_s20] sm:$0xff] %vm239_vm0, %v319_v17 }
 0x13d   : > { %339 = vst.msk [vmem:[%s221_s20 + $0x10] sm:$0xff] %vm239_vm0, %v329_v18 }
 0x13e   : > { %660 = shalt.err (!%p657_p5)
}
 0x13f   : > { %s661_s6 = scalar_lea.hbm %s945_s19, 512  ;;  %s665_s8 = scalar_lea.hbm %s1001_s3, 1024 }
 0x140   : > { %p662_p9 = scmp.ne.s32.totalorder %s945_s19, %s661_s6  ;;  %p666_p3 = scmp.lt.u32.totalorder %s945_s19, %s1001_s3 }
 0x141   : > { %p667_p7 = scmp.lt.u32.totalorder %s665_s8, %s661_s6  ;;  %p669_p13 = scmp.lt.u32.totalorder %s661_s6, %s945_s19 }
 0x142   : > { %p663_p1 = pnand %p662_p9, %p861_p10 }
 0x143   : > { %p668_p4 = por %p667_p7, %p666_p3 }
 0x144   : > { %p664_p2 = pneg %p663_p1 }
 0x145   : > { %p670_p6 = por %p669_p13, %p668_p4 }
 0x147   : > { %p671_p8 = pnand %p670_p6, %p664_p2 }
 0x149   : > { %674 = shalt.err (!%p671_p8)
}
 0x14a   : > { %s740_s10 = smov 128   ;;  %s741_s11 = smov 8  }
 0x14b   : > { %518 = dma.vmem_to_hbm [thread:$0]  (%p861_p10), %s940_s22, 512, %s945_s19, %s342_s15, %s740_s10, %s740_s10, %s741_s11  }
 0x14c PF: > { %s372_s9 = sand.u32 1, %s713_s12   ;;  %p1019_p12 = scmp.ne.s32.totalorder %s1009_s23, 0 }
 0x14d   : > { %p1020_p11 = scmp.ge.s32.totalorder %s733_s17, 2  ;;  %s373_s18 = scalar_lea.sflag [#allocation4], %s372_s9 }
 0x14f   : > { %p529_p0 = pnand %p1020_p11, %p1019_p12 }
 0x151   : > { %708 = dma.done.wait (!%p529_p0), %s373_s18, 512  }
 0x152   : > { %710 = vsyncadd (!%p529_p0), %s373_s18, 4294966784  ;;  %s20_s17 = sadd.s32 1, %s733_s17   ;;  %s1021_s12 = smov %s717_s13 }
 0x153   : > { %p17_p5 = scmp.ge.s32.totalorder %s20_s17, 4   ;;  %s1022_s13 = smov %s721_s14 }
 0x154   : > { %s1023_s14 = smov %s870_s5  ;;  %s1024_s15 = smov %s729_s16 }
 0x155   : > { %s1025_s16 = smov %s1027_s28  ;;  %19 = sbr.rel (!%p17_p5) target bundleno = 7 (0x7), region = 81 }
 0x15c   :  { %378 = vsyncpa [#allocation3], 1 }
 0x15d   :  { %380 = vsyncpa [#allocation3 + $0x1], 1 }
 0x15e   :  { %381 = vsyncpa [#allocation6], 1 }
 0x15f   :  { %382 = vsyncpa [#allocation4], 1 }
 0x160   :  { %384 = vsyncpa [#allocation4 + $0x1], 1 }

</bundles_post_ra>
